<compile_context>
chip_gen: v5e
topology: v5e:2x2
jax: 0.10.0
libtpu: 0.0.40
codegen_flags: <defaults>
</compile_context>

<pallas_src>
import functools

import jax
import jax.numpy as jnp
from jax.experimental import pallas as pl
from jax.experimental.pallas import tpu as pltpu


# ------------------------------ Pallas kernel -------------------------------

def _encoder_kernel(x_ref, a1_ref, a2_ref, a3_ref, w4_ref, w5_ref, b_ref,
                    o_ref, *, bias_sizes):
    """Whole BasicEncoder forward for a block of batch rows.

    conv1(+ReLU), conv2, [transpose->spatial conv(+ReLU)->transpose->flatten],
    Linear(+ReLU), Linear  -- each conv already folded into a dense operator.
    """
    n1, n2, n3, n4, n5 = bias_sizes
    bias = b_ref[...]                       # (5, max_len), rows = per-layer bias

    h = jnp.dot(x_ref[...], a1_ref[...], preferred_element_type=jnp.float32)
    h = jnp.maximum(h + bias[0:1, :n1], 0.0)                       # conv1 + ReLU

    h = jnp.dot(h, a2_ref[...], preferred_element_type=jnp.float32)
    h = h + bias[1:2, :n2]                                         # conv2

    h = jnp.dot(h, a3_ref[...], preferred_element_type=jnp.float32)
    h = jnp.maximum(h + bias[2:3, :n3], 0.0)                       # spatial conv + ReLU

    h = jnp.dot(h, w4_ref[...], preferred_element_type=jnp.float32)
    h = jnp.maximum(h + bias[3:4, :n4], 0.0)                       # linear1 + ReLU

    h = jnp.dot(h, w5_ref[...], preferred_element_type=jnp.float32)
    h = h + bias[4:5, :n5]                                         # linear2

    o_ref[...] = h.astype(o_ref.dtype)


def basic_encoder_forward(x, prep, *, latent):
    """x: (B, C, T) float32  ->  (B, C, latent), matching BasicEncoder.forward."""
    B, C, T = x.shape
    k0 = C * T
    x2 = x.reshape(B, k0)                 # row-major relabel: free (no copy)

    a1, a2, a3 = prep["A1"], prep["A2"], prep["A3"]
    w4, w5, bias = prep["W4t"], prep["W5t"], prep["bias"]
    n_out = w5.shape[1]
    bias_sizes = (a1.shape[1], a2.shape[1], a3.shape[1], w4.shape[1], w5.shape[1])

    bm = min(B, 128)                      # batch rows per grid step
    grid = (pl.cdiv(B, bm),)

    y = pl.pallas_call(
        functools.partial(_encoder_kernel, bias_sizes=bias_sizes),
        out_shape=jax.ShapeDtypeStruct((B, n_out), jnp.float32),
        grid=grid,
        in_specs=[
            pl.BlockSpec((bm, k0), lambda i: (i, 0)),         # activations: gridded
            pl.BlockSpec(a1.shape, lambda i: (0, 0)),         # weights: resident
            pl.BlockSpec(a2.shape, lambda i: (0, 0)),
            pl.BlockSpec(a3.shape, lambda i: (0, 0)),
            pl.BlockSpec(w4.shape, lambda i: (0, 0)),
            pl.BlockSpec(w5.shape, lambda i: (0, 0)),
            pl.BlockSpec(bias.shape, lambda i: (0, 0)),
        ],
        out_specs=pl.BlockSpec((bm, n_out), lambda i: (i, 0)),
        compiler_params=pltpu.CompilerParams(
            dimension_semantics=("parallel",)),               # megacore / pipelining
    )(x2, a1, a2, a3, w4, w5, bias)

    return y.reshape(B, C, latent)        # row-major relabel: free


# ----------------------- init-time weight preprocessing ----------------------

def _shift_matrix(l_in, l_out, stride, offset):
    """S[s, l] = 1 iff s == (l*stride + offset) mod l_in  (circular tap select)."""
    rows = jnp.arange(l_in)[:, None]
    cols = (jnp.arange(l_out)[None, :] * stride + offset) % l_in
    return (rows == cols).astype(jnp.float32)


def prepare_params(p, cfg):
    """Fold every conv (circular pad, stride, transposes, flatten) into dense
    (in_flat, out_flat) matmul operators.  Runs ONCE at init time."""
    C, T = cfg["C"], cfg["T"]
    Ctl, k1, k2, s2 = cfg["Ctl"], cfg["k1"], cfg["k2"], cfg["s2"]
    pre = cfg["pre"]
    ks_sp = C + (1 - C % 2)               # spacial_kernel_size

    p1 = k1 // 2
    L1 = T + 2 * p1 - k1 + 1
    p2 = k2 // 2
    L2 = (L1 + 2 * p2 - k2) // s2 + 1
    assert L2 == pre, (L2, pre)
    p3 = C // 2
    Lc = C + 2 * p3 - ks_sp + 1
    assert Lc == C, (Lc, C)

    # conv1: flat (C, T) -> flat (Ctl, L1)
    A1 = jnp.zeros((C * T, Ctl * L1), jnp.float32)
    for j in range(k1):
        A1 = A1 + jnp.kron(p["W1"][:, :, j].T, _shift_matrix(T, L1, 1, j - p1))
    b1f = jnp.repeat(p["b1"], L1)

    # conv2 (stride s2): flat (Ctl, L1) -> flat (C, L2)
    A2 = jnp.zeros((Ctl * L1, C * L2), jnp.float32)
    for j in range(k2):
        A2 = A2 + jnp.kron(p["W2"][:, :, j].T, _shift_matrix(L1, L2, s2, j - p2))
    b2f = jnp.repeat(p["b2"], L2)

    # transpose -> spatial conv -> transpose -> flatten: flat (C, L2) -> flat (C, pre)
    A3 = jnp.zeros((C * L2, Lc * pre), jnp.float32)
    for j in range(ks_sp):
        A3 = A3 + jnp.kron(_shift_matrix(C, Lc, 1, j - p3), p["W3"][:, :, j].T)
    b3f = jnp.tile(p["b3"], Lc)

    W4t = p["W4"].T                       # (C*pre, C*latent)
    W5t = p["W5"].T                       # (C*latent, C*latent)

    biases = [b1f, b2f, b3f, p["b4"], p["b5"]]
    maxlen = max(b.shape[0] for b in biases)
    bias = jnp.stack([jnp.pad(b, (0, maxlen - b.shape[0])) for b in biases])

    return dict(A1=A1, A2=A2, A3=A3, W4t=W4t, W5t=W5t, bias=bias)


# ---------------------------- pure-JAX reference -----------------------------

def circular_pad_last(x, pad):
    if pad == 0:
        return x
    return jnp.concatenate([x[..., -pad:], x, x[..., :pad]], axis=-1)


def _ref_conv1d_circular(x, W, b, stride, pad):
    xp = circular_pad_last(x, pad)
    K = W.shape[2]
    Lout = (xp.shape[-1] - K) // stride + 1
    out = jnp.zeros((x.shape[0], W.shape[0], Lout), jnp.float32)
    for k in range(K):
        sl = xp[:, :, k: k + stride * (Lout - 1) + 1: stride]   # (B, Cin, Lout)
        out = out + jnp.einsum("oc,bcl->bol", W[:, :, k], sl)
    return out + b[None, :, None]


def ref_forward(x, p, cfg):
    C, latent = cfg["C"], cfg["latent"]
    h = _ref_conv1d_circular(x, p["W1"], p["b1"], 1, cfg["k1"] // 2)
    h = jnp.maximum(h, 0.0)
    h = _ref_conv1d_circular(h, p["W2"], p["b2"], cfg["s2"], cfg["k2"] // 2)
    h = jnp.transpose(h, (0, 2, 1))
    h = _ref_conv1d_circular(h, p["W3"], p["b3"], 1, C // 2)
    h = jnp.maximum(h, 0.0)
    h = jnp.transpose(h, (0, 2, 1))
    h = h.reshape(h.shape[0], -1)
    h = jnp.maximum(h @ p["W4"].T + p["b4"], 0.0)
    h = h @ p["W5"].T + p["b5"]
    return h.reshape(h.shape[0], C, latent)


# ---------------------------------- main -------------------------------------

if __name__ == "__main__":
    # Module hyperparameters (small, mutually consistent):
    B = 2
    C = 4            # num_channels
    T = 16           # num_input_time_steps
    Ctl = 8          # num_temporal_latent_chans
    k1 = 3           # initial_temporal_kernel_size
    k2 = 3           # final_temperal_kernel_size
    s2 = 2           # final_temperal_kernel_stride
    pre = 8          # pre_linear_dim  == (T + 2*(k2//2) - k2)//s2 + 1
    latent = 6       # latent_node_state_dim
    ks_sp = C + (1 - C % 2)   # spacial_kernel_size = 5

    cfg = dict(C=C, T=T, Ctl=Ctl, k1=k1, k2=k2, s2=s2, pre=pre, latent=latent)

    key = jax.random.PRNGKey(0)
    keys = jax.random.split(key, 11)

    def init(k, shape, scale=0.1):
        return scale * jax.random.normal(k, shape, jnp.float32)

    params = {
        "W1": init(keys[0], (Ctl, C, k1)),
        "b1": init(keys[1], (Ctl,)),
        "W2": init(keys[2], (C, Ctl, k2)),
        "b2": init(keys[3], (C,)),
        "W3": init(keys[4], (pre, pre, ks_sp)),
        "b3": init(keys[5], (pre,)),
        "W4": init(keys[6], (C * latent, C * pre)),
        "b4": init(keys[7], (C * latent,)),
        "W5": init(keys[8], (C * latent, C * latent)),
        "b5": init(keys[9], (C * latent,)),
    }

    x = jax.random.normal(keys[10], (B, C, T), jnp.float32)

    # One-time (init) weight preprocessing, then a single fused Pallas call.
    prep = prepare_params(params, cfg)
    fwd = jax.jit(functools.partial(basic_encoder_forward, latent=latent))

    out = jax.block_until_ready(fwd(x, prep))
    ref = jax.block_until_ready(ref_forward(x, params, cfg))

    assert out.shape == (B, C, latent), out.shape
    assert jnp.allclose(out, ref, atol=1e-4, rtol=1e-4), (
        f"max abs err = {jnp.max(jnp.abs(out - ref))}")

    print("KERNEL_OK")
</pallas_src>

<mosaic_0001>
module attributes {stable_mosaic.version = 11 : i64} {
  func.func @_encoder_kernel(%arg0: i32, %arg1: memref<2x64xf32, #tpu.memory_space<vmem>>, %arg2: memref<64x128xf32, #tpu.memory_space<vmem>>, %arg3: memref<128x32xf32, #tpu.memory_space<vmem>>, %arg4: memref<32x32xf32, #tpu.memory_space<vmem>>, %arg5: memref<32x24xf32, #tpu.memory_space<vmem>>, %arg6: memref<24x24xf32, #tpu.memory_space<vmem>>, %arg7: memref<5x128xf32, #tpu.memory_space<vmem>>, %arg8: memref<2x24xf32, #tpu.memory_space<vmem>>) attributes {dimension_semantics = [#tpu.dimension_semantics<parallel>], iteration_bounds = array<i64: 1>, scalar_prefetch = 0 : i64, scratch_operands = 0 : i64, tpu.core_type = #tpu.core_type<tc>, window_params = [{transform_indices = @transform_0, window_bounds = array<i64: 2, 64>}, {pipeline_mode = #tpu.pipeline_mode<synchronous>, transform_indices = @transform_1, window_bounds = array<i64: 64, 128>}, {pipeline_mode = #tpu.pipeline_mode<synchronous>, transform_indices = @transform_2, window_bounds = array<i64: 128, 32>}, {pipeline_mode = #tpu.pipeline_mode<synchronous>, transform_indices = @transform_3, window_bounds = array<i64: 32, 32>}, {pipeline_mode = #tpu.pipeline_mode<synchronous>, transform_indices = @transform_4, window_bounds = array<i64: 32, 24>}, {pipeline_mode = #tpu.pipeline_mode<synchronous>, transform_indices = @transform_5, window_bounds = array<i64: 24, 24>}, {pipeline_mode = #tpu.pipeline_mode<synchronous>, transform_indices = @transform_6, window_bounds = array<i64: 5, 128>}, {transform_indices = @transform_7, window_bounds = array<i64: 2, 24>}]} {
    %c0 = arith.constant 0 : index
    %c0_0 = arith.constant 0 : index
    %0 = vector.load %arg7[%c0, %c0_0] : memref<5x128xf32, #tpu.memory_space<vmem>>, vector<5x128xf32>
    %c0_1 = arith.constant 0 : index
    %c0_2 = arith.constant 0 : index
    %1 = vector.load %arg1[%c0_1, %c0_2] : memref<2x64xf32, #tpu.memory_space<vmem>>, vector<2x64xf32>
    %c0_3 = arith.constant 0 : index
    %c0_4 = arith.constant 0 : index
    %2 = vector.load %arg2[%c0_3, %c0_4] : memref<64x128xf32, #tpu.memory_space<vmem>>, vector<64x128xf32>
    %cst = arith.constant dense<0.000000e+00> : vector<2x128xf32>
    %3 = tpu.matmul %1, %2, %cst {dimension_numbers = #tpu.dot_dimension_numbers<[1], [0], [0], [1], [0, 0, 1, 1], [], []>} : vector<2x64xf32>, vector<64x128xf32>, vector<2x128xf32> -> vector<2x128xf32>
    %4 = vector.extract_strided_slice %0 {offsets = [0, 0], sizes = [1, 128], strides = [1, 1]} : vector<5x128xf32> to vector<1x128xf32>
    %5 = vector.broadcast %4 : vector<1x128xf32> to vector<2x128xf32>
    %6 = arith.addf %3, %5 : vector<2x128xf32>
    %cst_5 = arith.constant 0.000000e+00 : f32
    %7 = vector.broadcast %cst_5 : f32 to vector<2x128xf32>
    %8 = arith.maximumf %6, %7 : vector<2x128xf32>
    %c0_6 = arith.constant 0 : index
    %c0_7 = arith.constant 0 : index
    %9 = vector.load %arg3[%c0_6, %c0_7] : memref<128x32xf32, #tpu.memory_space<vmem>>, vector<128x32xf32>
    %cst_8 = arith.constant dense<0.000000e+00> : vector<2x32xf32>
    %10 = tpu.matmul %8, %9, %cst_8 {dimension_numbers = #tpu.dot_dimension_numbers<[1], [0], [0], [1], [0, 0, 1, 1], [], []>} : vector<2x128xf32>, vector<128x32xf32>, vector<2x32xf32> -> vector<2x32xf32>
    %11 = vector.extract_strided_slice %0 {offsets = [1, 0], sizes = [1, 32], strides = [1, 1]} : vector<5x128xf32> to vector<1x32xf32>
    %12 = vector.broadcast %11 : vector<1x32xf32> to vector<2x32xf32>
    %13 = arith.addf %10, %12 : vector<2x32xf32>
    %c0_9 = arith.constant 0 : index
    %c0_10 = arith.constant 0 : index
    %14 = vector.load %arg4[%c0_9, %c0_10] : memref<32x32xf32, #tpu.memory_space<vmem>>, vector<32x32xf32>
    %cst_11 = arith.constant dense<0.000000e+00> : vector<2x32xf32>
    %15 = tpu.matmul %13, %14, %cst_11 {dimension_numbers = #tpu.dot_dimension_numbers<[1], [0], [0], [1], [0, 0, 1, 1], [], []>} : vector<2x32xf32>, vector<32x32xf32>, vector<2x32xf32> -> vector<2x32xf32>
    %16 = vector.extract_strided_slice %0 {offsets = [2, 0], sizes = [1, 32], strides = [1, 1]} : vector<5x128xf32> to vector<1x32xf32>
    %17 = vector.broadcast %16 : vector<1x32xf32> to vector<2x32xf32>
    %18 = arith.addf %15, %17 : vector<2x32xf32>
    %cst_12 = arith.constant 0.000000e+00 : f32
    %19 = vector.broadcast %cst_12 : f32 to vector<2x32xf32>
    %20 = arith.maximumf %18, %19 : vector<2x32xf32>
    %c0_13 = arith.constant 0 : index
    %c0_14 = arith.constant 0 : index
    %21 = vector.load %arg5[%c0_13, %c0_14] : memref<32x24xf32, #tpu.memory_space<vmem>>, vector<32x24xf32>
    %cst_15 = arith.constant dense<0.000000e+00> : vector<2x24xf32>
    %22 = tpu.matmul %20, %21, %cst_15 {dimension_numbers = #tpu.dot_dimension_numbers<[1], [0], [0], [1], [0, 0, 1, 1], [], []>} : vector<2x32xf32>, vector<32x24xf32>, vector<2x24xf32> -> vector<2x24xf32>
    %23 = vector.extract_strided_slice %0 {offsets = [3, 0], sizes = [1, 24], strides = [1, 1]} : vector<5x128xf32> to vector<1x24xf32>
    %24 = vector.broadcast %23 : vector<1x24xf32> to vector<2x24xf32>
    %25 = arith.addf %22, %24 : vector<2x24xf32>
    %cst_16 = arith.constant 0.000000e+00 : f32
    %26 = vector.broadcast %cst_16 : f32 to vector<2x24xf32>
    %27 = arith.maximumf %25, %26 : vector<2x24xf32>
    %c0_17 = arith.constant 0 : index
    %c0_18 = arith.constant 0 : index
    %28 = vector.load %arg6[%c0_17, %c0_18] : memref<24x24xf32, #tpu.memory_space<vmem>>, vector<24x24xf32>
    %cst_19 = arith.constant dense<0.000000e+00> : vector<2x24xf32>
    %29 = tpu.matmul %27, %28, %cst_19 {dimension_numbers = #tpu.dot_dimension_numbers<[1], [0], [0], [1], [0, 0, 1, 1], [], []>} : vector<2x24xf32>, vector<24x24xf32>, vector<2x24xf32> -> vector<2x24xf32>
    %30 = vector.extract_strided_slice %0 {offsets = [4, 0], sizes = [1, 24], strides = [1, 1]} : vector<5x128xf32> to vector<1x24xf32>
    %31 = vector.broadcast %30 : vector<1x24xf32> to vector<2x24xf32>
    %32 = arith.addf %29, %31 : vector<2x24xf32>
    %c0_20 = arith.constant 0 : index
    %c0_21 = arith.constant 0 : index
    %33 = vector.load %arg8[%c0_20, %c0_21] : memref<2x24xf32, #tpu.memory_space<vmem>>, vector<2x24xf32>
    tpu.vector_store %arg8[%c0_20, %c0_21], %32 {strides = array<i32>} : memref<2x24xf32, #tpu.memory_space<vmem>>, vector<2x24xf32>,
    return
  }
  func.func @transform_0(%arg0: i32) -> (i32, i32) {
    %c0_i32 = arith.constant 0 : i32
    %c0_i32_0 = arith.constant 0 : i32
    return %arg0, %c0_i32 : i32, i32
  }
  func.func @transform_1(%arg0: i32) -> (i32, i32) {
    %c0_i32 = arith.constant 0 : i32
    %c0_i32_0 = arith.constant 0 : i32
    %c0_i32_1 = arith.constant 0 : i32
    return %c0_i32, %c0_i32_0 : i32, i32
  }
  func.func @transform_2(%arg0: i32) -> (i32, i32) {
    %c0_i32 = arith.constant 0 : i32
    %c0_i32_0 = arith.constant 0 : i32
    %c0_i32_1 = arith.constant 0 : i32
    return %c0_i32, %c0_i32_0 : i32, i32
  }
  func.func @transform_3(%arg0: i32) -> (i32, i32) {
    %c0_i32 = arith.constant 0 : i32
    %c0_i32_0 = arith.constant 0 : i32
    %c0_i32_1 = arith.constant 0 : i32
    return %c0_i32, %c0_i32_0 : i32, i32
  }
  func.func @transform_4(%arg0: i32) -> (i32, i32) {
    %c0_i32 = arith.constant 0 : i32
    %c0_i32_0 = arith.constant 0 : i32
    %c0_i32_1 = arith.constant 0 : i32
    return %c0_i32, %c0_i32_0 : i32, i32
  }
  func.func @transform_5(%arg0: i32) -> (i32, i32) {
    %c0_i32 = arith.constant 0 : i32
    %c0_i32_0 = arith.constant 0 : i32
    %c0_i32_1 = arith.constant 0 : i32
    return %c0_i32, %c0_i32_0 : i32, i32
  }
  func.func @transform_6(%arg0: i32) -> (i32, i32) {
    %c0_i32 = arith.constant 0 : i32
    %c0_i32_0 = arith.constant 0 : i32
    %c0_i32_1 = arith.constant 0 : i32
    return %c0_i32, %c0_i32_0 : i32, i32
  }
  func.func @transform_7(%arg0: i32) -> (i32, i32) {
    %c0_i32 = arith.constant 0 : i32
    %c0_i32_0 = arith.constant 0 : i32
    return %arg0, %c0_i32 : i32, i32
  }
}

</mosaic_0001>

<bundles_post_ra>
// kernel: basic_encoder_forward.1
= control target key start
LH: loop header
LB: loop body
LE: loop exit
PB: predicated region body
PF: predicated region fallthrough
CT: control target
= control target key end

     0   :  { %vm37_vm0 = vcmask 523264   ;;  %vm104_vm1 = vcmask 261120   ;;  %vm162_vm2 = vcmask 195584   ;;  %vm186_vm3 = vcmask 189440   ;;  %s352_s1 = inlined_call_operand.vmem [shape: f32[64,128], index: 1, kind: input, shape index: {}]   ;;  %s353_s2 = inlined_call_operand.vmem [shape: f32[128,32], index: 2, kind: input, shape index: {}]   ;;  %s354_s0 = inlined_call_operand.vmem [shape: f32[2,64], index: 0, kind: input, shape index: {}]   ;;  %s355_s3 = inlined_call_operand.vmem [shape: f32[32,32], index: 3, kind: input, shape index: {}]   ;;  %s356_s6 = inlined_call_operand.vmem [shape: f32[5,128], index: 6, kind: input, shape index: {}]   ;;  %s357_s4 = inlined_call_operand.vmem [shape: f32[32,24], index: 4, kind: input, shape index: {}]   ;;  %s358_s5 = inlined_call_operand.vmem [shape: f32[24,24], index: 5, kind: input, shape index: {}]   ;;  %s359_s7 = inlined_call_operand.vmem [shape: f32[2,24], index: 7, kind: output, shape index: {}]  }
   0x1   :  { %v35_v0 = vld [vmem:[%s352_s1 + $0x38] sm:$0xff]  ;;  %v34_v1 = vld [vmem:[%s352_s1 + $0x30] sm:$0xff]  ;;  %v33_v2 = vld [vmem:[%s352_s1 + $0x28] sm:$0xff] }
   0x2   :  { %49 = vmatpush.msra.mxu0 %v35_v0  ;;  %v77_v3 = vld [vmem:[%s353_s2 + $0x78] sm:$0xff]  ;;  %v76_v4 = vld [vmem:[%s353_s2 + $0x70] sm:$0xff]  ;;  %v32_v5 = vld [vmem:[%s352_s1 + $0x20] sm:$0xff] }
   0x3   :  { %79 = vmatpush.msra.mxu1 %v77_v3  ;;  %v75_v6 = vld [vmem:[%s353_s2 + $0x68] sm:$0xff]  ;;  %v31_v7 = vld [vmem:[%s352_s1 + $0x18] sm:$0xff]  ;;  %v74_v8 = vld [vmem:[%s353_s2 + $0x60] sm:$0xff] }
   0x4   :  { %50 = vmatpush.msra.mxu0 %v34_v1  ;;  %v30_v9 = vld [vmem:[%s352_s1 + $0x10] sm:$0xff]  ;;  %v73_v10 = vld [vmem:[%s353_s2 + $0x58] sm:$0xff]  ;;  %v29_v11 = vld [vmem:[%s352_s1 + $0x8] sm:$0xff] }
   0x5   :  { %80 = vmatpush.msra.mxu1 %v76_v4  ;;  %v72_v12 = vld [vmem:[%s353_s2 + $0x50] sm:$0xff]  ;;  %v28_v13 = vld [vmem:[%s352_s1] sm:$0xff]  ;;  %v71_v15 = vld [vmem:[%s353_s2 + $0x48] sm:$0xff] }
   0x6   :  { %51 = vmatpush.msra.mxu0 %v33_v2  ;;  %v27_v14 = vld [vmem:[%s354_s0] sm:$0x3]  ;;  %v69_v17 = vld [vmem:[%s353_s2 + $0x38] sm:$0xff]  ;;  %v68_v18 = vld [vmem:[%s353_s2 + $0x30] sm:$0xff] }
   0x7   :  { %81 = vmatpush.msra.mxu1 %v75_v6  ;;  %v70_v16 = vld [vmem:[%s353_s2 + $0x40] sm:$0xff]  ;;  %v67_v19 = vld [vmem:[%s353_s2 + $0x28] sm:$0xff]  ;;  %v65_v21 = vld [vmem:[%s353_s2 + $0x18] sm:$0xff] }
   0x8   :  { %52 = vmatpush.msra.mxu0 %v32_v5  ;;  %v66_v20 = vld [vmem:[%s353_s2 + $0x20] sm:$0xff]  ;;  %v64_v22 = vld [vmem:[%s353_s2 + $0x10] sm:$0xff]  ;;  %v63_v23 = vld [vmem:[%s353_s2 + $0x8] sm:$0xff] }
   0x9   :  { %82 = vmatpush.msra.mxu1 %v74_v8  ;;  %v62_v24 = vld [vmem:[%s353_s2] sm:$0xff]  ;;  %v102_v25 = vld [vmem:[%s355_s3 + $0x18] sm:$0xff]  ;;  %v101_v26 = vld [vmem:[%s355_s3 + $0x10] sm:$0xff] }
   0xa   :  { %53 = vmatpush.msra.mxu0 %v31_v7  ;;  %120 = vmatpush.msra.mxu2 %v102_v25  ;;  %v26_v27 = vld [vmem:[%s356_s6] sm:$0x1f]  ;;  %v100_v32 = vld [vmem:[%s355_s3 + $0x8] sm:$0xff]  ;;  %v132_v34 = vld [vmem:[%s357_s4 + $0x18] sm:$0xff] }
   0xb   :  { %83 = vmatpush.msra.mxu1 %v73_v10  ;;  %v36_v28 = vperm.slane %v26_v27, 0  ;;  %v99_v33 = vld [vmem:[%s355_s3] sm:$0xff]  ;;  %149 = vmatpush.msra.mxu3 %v132_v34  ;;  %v78_v35 = vperm.slane %v26_v27, 1  ;;  %v131_v38 = vld [vmem:[%s357_s4 + $0x10] sm:$0xff]  ;;  %v130_v39 = vld [vmem:[%s357_s4 + $0x8] sm:$0xff]  ;;  %v103_v42 = vperm.slane %v26_v27, 2 }
   0xc   :  { %54 = vmatpush.msra.mxu0 %v30_v9  ;;  %121 = vmatpush.msra.mxu2 %v101_v26  ;;  %v129_v40 = vld [vmem:[%s357_s4] sm:$0xff]  ;;  %v160_v41 = vld [vmem:[%s358_s5 + $0x10] sm:$0xff]  ;;  %v159_v46 = vld [vmem:[%s358_s5 + $0x8] sm:$0xff]  ;;  %v133_v48 = vperm.slane %v26_v27, 3  ;;  %v161_v52 = vperm.slane %v26_v27, 4 }
   0xd   :  { %84 = vmatpush.msra.mxu1 %v72_v12  ;;  %150 = vmatpush.msra.mxu3 %v131_v38  ;;  %v158_v47 = vld [vmem:[%s358_s5] sm:$0xff] }
   0xe   :  { %55 = vmatpush.msra.mxu0 %v29_v11  ;;  %122 = vmatpush.msra.mxu2 %v100_v32 }
   0xf   :  { %85 = vmatpush.msra.mxu1 %v71_v15  ;;  %151 = vmatpush.msra.mxu3 %v130_v39 }
  0x10   :  { %56 = vmatpush.msra.mxu0 %v28_v13  ;;  %123 = vmatpush.msra.mxu2 %v99_v33 }
  0x11   :  { %192 = vmatmul.msk.f32.vlgmr.msra.gmra.mxu0 %vm37_vm0, %v27_v14  ;;  %86 = vmatpush.msra.mxu1 %v70_v16 }
  0x12   :  { %152 = vmatpush.msra.mxu3 %v129_v40  ;;  %179 = vmatpush.msrb.mxu2 %v160_v41 }
  0x13   :  { %87 = vmatpush.msra.mxu1 %v69_v17 }
  0x14   :  { %180 = vmatpush.msrb.mxu2 %v159_v46 }
  0x15   :  { %88 = vmatpush.msra.mxu1 %v68_v18 }
  0x16   :  { %181 = vmatpush.msrb.mxu2 %v158_v47 }
  0x17   :  { %89 = vmatpush.msra.mxu1 %v67_v19 }
  0x19   :  { %90 = vmatpush.msra.mxu1 %v66_v20 }
  0x1b   :  { %91 = vmatpush.msra.mxu1 %v65_v21 }
  0x1d   :  { %92 = vmatpush.msra.mxu1 %v64_v22 }
  0x1f   :  { %93 = vmatpush.msra.mxu1 %v63_v23 }
  0x21   :  { %94 = vmatpush.msra.mxu1 %v62_v24 }
  0x8e   :  { %v58_v29 = vpop.f32.mrf.mxu0 }
  0x8f   :  { %v59_v30 = vadd.f32 %v58_v29, %v36_v28 }
  0x91   :  { %v61_v31 = vmax.f32 %v59_v30, 0.0 }
  0x93   :  { %95 = vmatmul.f32.vlgmr.msra.gmra.mxu1 %v61_v31 }
 0x110   :  { %v96_v36 = vpop.f32.mrf.mxu1 }
 0x111   :  { %v97_v37 = vadd.f32 %v96_v36, %v78_v35 }
 0x113   :  { %193 = vmatmul.msk.f32.vlgmr.msra.gmra.mxu2 %vm104_vm1, %v97_v37 }
 0x196   :  { %v125_v43 = vpop.f32.mrf.mxu2 }
 0x197   :  { %v126_v44 = vadd.f32 %v125_v43, %v103_v42 }
 0x199   :  { %v128_v45 = vmax.f32 %v126_v44, 0.0 }
 0x19b   :  { %194 = vmatmul.msk.f32.vlgmr.msra.gmra.mxu3 %vm104_vm1, %v128_v45 }
 0x21e   :  { %v154_v49 = vpop.f32.mrf.mxu3 }
 0x21f   :  { %v155_v50 = vadd.f32 %v154_v49, %v133_v48 }
 0x221   :  { %v157_v51 = vmax.f32 %v155_v50, 0.0 }
 0x223   :  { %195 = vmatmul.msk.f32.vlgmr.msrb.gmra.mxu2 %vm162_vm2, %v157_v51 }
 0x2a6   :  { %v183_v53 = vpop.f32.mrf.mxu2 }
 0x2a7   :  { %v184_v54 = vadd.f32 %v183_v53, %v161_v52 }
 0x2a9   :  { %187 = vst.msk [vmem:[%s359_s7] sm:$0x3] %vm186_vm3, %v184_v54 }

</bundles_post_ra>
